<compile_context>
chip_gen: v5e
topology: v5e:2x2
jax: 0.10.0
libtpu: 0.0.40
codegen_flags: <defaults>
</compile_context>

<pallas_src>
import functools

import jax
import jax.numpy as jnp
from jax.experimental import pallas as pl
from jax.experimental.pallas import tpu as pltpu

LANE = 128


def _round_up(x, m):
    return ((x + m - 1) // m) * m


def _pick_batch_tile(B, S, E, itemsize):
    """Batch tile sized so the double-buffered activation tile stays well under
    v7x's smaller (64 MiB physical / ~32 MiB scoped) VMEM budget."""
    if B <= 8:
        return B
    budget = 8 * 1024 * 1024                  # ~8 MiB for 2 x (B_TILE, S, E)
    per_row = 2 * S * E * itemsize
    t = budget // max(per_row, 1)
    t = int(max(8, min(t, 128, B)))
    return (t // 8) * 8                       # keep output sublane dim 8-aligned


def _fused_kernel(filter_sizes, emb_ref, *refs):
    """Fused conv(all filter sizes) + max-pool + bias + ReLU + FC for one batch tile.

    emb_ref: (Bt, S, E)           compute dtype (f32 or bf16)
    refs:    w_0..w_{n-1}         (fs_i*E, Fp)   compute dtype
             conv_b_cat           (1, n_fs*Fp)   f32
             fc_w                 (n_fs*Fp, Tp)  compute dtype
             fc_b                 (1, Tp)        f32
             out_ref              (Bt, Tp)       f32
    """
    n_fs = len(filter_sizes)
    w_refs = refs[:n_fs]
    cb_ref, fcw_ref, fcb_ref, out_ref = refs[n_fs:]

    emb = emb_ref[...]
    Bt, S, E = emb.shape

    pooled = []
    for i, fs in enumerate(filter_sizes):
        L = S - fs + 1
        # im2col window -> single lane-dense MXU matmul: M = Bt*L, K = fs*E, N = Fp.
        win = jnp.concatenate([emb[:, k:k + L, :] for k in range(fs)], axis=-1)
        win = win.reshape(Bt * L, fs * E)
        conv = jnp.dot(win, w_refs[i][...],
                       preferred_element_type=jnp.float32)      # (Bt*L, Fp) f32
        conv = conv.reshape(Bt, L, conv.shape[-1])
        pooled.append(jnp.max(conv, axis=1))                      # (Bt, Fp)

    cat = jnp.concatenate(pooled, axis=-1)                        # (Bt, n_fs*Fp) f32
    # Bias + ReLU hoisted after the max (bias constant over time, ReLU monotone).
    cat = jnp.maximum(cat + cb_ref[...], 0.0)

    out = jnp.dot(cat.astype(fcw_ref.dtype), fcw_ref[...],
                  preferred_element_type=jnp.float32) + fcb_ref[...]
    out_ref[...] = out.astype(out_ref.dtype)


def prepare_params(params, filter_sizes, n_filters, target,
                   compute_dtype=jnp.float32):
    """Pad/transpose the torch-layout params into kernel-friendly, lane-dense layouts."""
    FP = _round_up(n_filters, LANE)
    TP = _round_up(target, LANE)
    n_fs = len(filter_sizes)

    conv_w_p, conv_b_p = [], []
    for i, fs in enumerate(filter_sizes):
        w = params["conv_w"][i]                                   # (fs, E, F)
        E = w.shape[1]
        w2 = w.reshape(fs * E, n_filters)                         # matches im2col concat order
        w2 = jnp.zeros((fs * E, FP), compute_dtype).at[:, :n_filters].set(
            w2.astype(compute_dtype))
        conv_w_p.append(w2)
        b = params["conv_b"][i].reshape(1, n_filters).astype(jnp.float32)
        conv_b_p.append(jnp.zeros((1, FP), jnp.float32).at[:, :n_filters].set(b))
    conv_b_cat = jnp.concatenate(conv_b_p, axis=1)                # (1, n_fs*FP)

    fc_w = params["fc_w"]                                         # (n_fs*F, target)
    fcw_p = jnp.zeros((n_fs * FP, TP), jnp.float32)
    for i in range(n_fs):
        fcw_p = fcw_p.at[i * FP:i * FP + n_filters, :target].set(
            fc_w[i * n_filters:(i + 1) * n_filters, :])
    fcw_p = fcw_p.astype(compute_dtype)
    fcb_p = jnp.zeros((1, TP), jnp.float32).at[:, :target].set(
        params["fc_b"].reshape(1, target).astype(jnp.float32))

    return {
        "embedding": params["embedding"].astype(compute_dtype),
        "conv_w": conv_w_p,
        "conv_b_cat": conv_b_cat,
        "fc_w": fcw_p,
        "fc_b": fcb_p,
        "n_filters_padded": FP,
        "target_padded": TP,
        "target": target,
    }


def cnn_forward(x_tokens, prepared, filter_sizes):
    """Forward pass equivalent to Cnn.forward (inference)."""
    emb_table = prepared["embedding"]                 # (V, E)
    embedded = emb_table[x_tokens]                    # (B, S, E) gather in XLA (glue)
    B, S, E = embedded.shape

    # Mirrors `assert conved[0].shape[2] > 3` in the PyTorch forward.
    assert S - filter_sizes[0] + 1 > 3

    TP = prepared["target_padded"]
    b_tile = _pick_batch_tile(B, S, E, embedded.dtype.itemsize)
    grid = (pl.cdiv(B, b_tile),)

    in_specs = [pl.BlockSpec((b_tile, S, E), lambda b: (b, 0, 0))]
    in_specs += [pl.BlockSpec(w.shape, lambda b: (0, 0)) for w in prepared["conv_w"]]
    in_specs += [
        pl.BlockSpec(prepared["conv_b_cat"].shape, lambda b: (0, 0)),
        pl.BlockSpec(prepared["fc_w"].shape, lambda b: (0, 0)),
        pl.BlockSpec(prepared["fc_b"].shape, lambda b: (0, 0)),
    ]
    out_spec = pl.BlockSpec((b_tile, TP), lambda b: (b, 0))

    out_padded = pl.pallas_call(
        functools.partial(_fused_kernel, tuple(filter_sizes)),
        out_shape=jax.ShapeDtypeStruct((B, TP), jnp.float32),
        grid=grid,
        in_specs=in_specs,
        out_specs=out_spec,
        compiler_params=pltpu.CompilerParams(
            dimension_semantics=("parallel",)),
    )(embedded, *prepared["conv_w"], prepared["conv_b_cat"],
      prepared["fc_w"], prepared["fc_b"])

    # Dropout(0.1): identity at inference.  Slice off lane padding.
    return out_padded[:, :prepared["target"]]


def reference_forward(x_tokens, params, filter_sizes):
    """Pure-JAX f32 reference with the original math (for correctness check)."""
    emb = params["embedding"][x_tokens]
    pooled = []
    for i, fs in enumerate(filter_sizes):
        w = params["conv_w"][i]
        b = params["conv_b"][i]
        L = emb.shape[1] - fs + 1
        conv = sum(
            jnp.einsum("ble,ef->blf", emb[:, k:k + L, :], w[k]) for k in range(fs)
        ) + b
        conv = jnp.maximum(conv, 0.0)
        pooled.append(jnp.max(conv, axis=1))
    cat = jnp.concatenate(pooled, axis=1)
    return cat @ params["fc_w"] + params["fc_b"]


def init_params(key, vocab_size, embedding_dim, n_filters, filter_sizes, target,
                padding_idx=0):
    keys = jax.random.split(key, 3 + 2 * len(filter_sizes))
    emb = 0.1 * jax.random.normal(keys[0], (vocab_size, embedding_dim), jnp.float32)
    emb = emb.at[padding_idx].set(0.0)       # padding_idx row is zero

    conv_w, conv_b = [], []
    for i, fs in enumerate(filter_sizes):
        w = 0.1 * jax.random.normal(
            keys[1 + 2 * i], (fs, embedding_dim, n_filters), jnp.float32
        )
        b = 0.1 * jax.random.normal(keys[2 + 2 * i], (1, n_filters), jnp.float32)
        conv_w.append(w)
        conv_b.append(b)

    d_in = len(filter_sizes) * n_filters
    fc_w = 0.1 * jax.random.normal(keys[-2], (d_in, target), jnp.float32)
    fc_b = 0.1 * jax.random.normal(keys[-1], (1, target), jnp.float32)

    return {
        "embedding": emb,
        "conv_w": conv_w,
        "conv_b": conv_b,
        "fc_w": fc_w,
        "fc_b": fc_b,
    }


if __name__ == "__main__":
    vocab_size = 50
    embedding_dim = 32
    n_filters = 8
    filter_sizes = (2, 3, 4)
    target = 5
    batch, seq = 2, 16

    key = jax.random.PRNGKey(0)
    k_params, k_tokens = jax.random.split(key)

    params = init_params(
        k_params, vocab_size, embedding_dim, n_filters, filter_sizes, target
    )
    x_tokens = jax.random.randint(k_tokens, (batch, seq), 0, vocab_size, jnp.int32)

    ref = jax.block_until_ready(reference_forward(x_tokens, params, filter_sizes))

    # f32 compute path: exact match with the f32 reference.
    prep_f32 = prepare_params(params, filter_sizes, n_filters, target,
                              compute_dtype=jnp.float32)
    out_f32 = jax.block_until_ready(cnn_forward(x_tokens, prep_f32, filter_sizes))
    assert out_f32.shape == (batch, target)
    assert jnp.allclose(out_f32, ref, atol=1e-5, rtol=1e-5)

    # bf16 matmul inputs (f32 accumulation / epilogue): v6e/v7x fast path.
    prep_bf16 = prepare_params(params, filter_sizes, n_filters, target,
                               compute_dtype=jnp.bfloat16)
    out_bf16 = jax.block_until_ready(cnn_forward(x_tokens, prep_bf16, filter_sizes))
    assert out_bf16.shape == (batch, target)
    assert jnp.allclose(out_bf16, ref, atol=3e-2, rtol=3e-2)

    print("KERNEL_OK")
</pallas_src>

<mosaic_0001>
module attributes {stable_mosaic.version = 11 : i64} {
  func.func @_fused_kernel(%arg0: i32, %arg1: memref<2x16x32xf32, #tpu.memory_space<vmem>>, %arg2: memref<64x128xf32, #tpu.memory_space<vmem>>, %arg3: memref<96x128xf32, #tpu.memory_space<vmem>>, %arg4: memref<128x128xf32, #tpu.memory_space<vmem>>, %arg5: memref<1x384xf32, #tpu.memory_space<vmem>>, %arg6: memref<384x128xf32, #tpu.memory_space<vmem>>, %arg7: memref<1x128xf32, #tpu.memory_space<vmem>>, %arg8: memref<2x128xf32, #tpu.memory_space<vmem>>) attributes {dimension_semantics = [#tpu.dimension_semantics<parallel>], iteration_bounds = array<i64: 1>, scalar_prefetch = 0 : i64, scratch_operands = 0 : i64, tpu.core_type = #tpu.core_type<tc>, window_params = [{transform_indices = @transform_0, window_bounds = array<i64: 2, 16, 32>}, {pipeline_mode = #tpu.pipeline_mode<synchronous>, transform_indices = @transform_1, window_bounds = array<i64: 64, 128>}, {pipeline_mode = #tpu.pipeline_mode<synchronous>, transform_indices = @transform_2, window_bounds = array<i64: 96, 128>}, {pipeline_mode = #tpu.pipeline_mode<synchronous>, transform_indices = @transform_3, window_bounds = array<i64: 128, 128>}, {pipeline_mode = #tpu.pipeline_mode<synchronous>, transform_indices = @transform_4, window_bounds = array<i64: 1, 384>}, {pipeline_mode = #tpu.pipeline_mode<synchronous>, transform_indices = @transform_5, window_bounds = array<i64: 384, 128>}, {pipeline_mode = #tpu.pipeline_mode<synchronous>, transform_indices = @transform_6, window_bounds = array<i64: 1, 128>}, {transform_indices = @transform_7, window_bounds = array<i64: 2, 128>}]} {
    %c0 = arith.constant 0 : index
    %c0_0 = arith.constant 0 : index
    %c0_1 = arith.constant 0 : index
    %0 = vector.load %arg1[%c0, %c0_0, %c0_1] : memref<2x16x32xf32, #tpu.memory_space<vmem>>, vector<2x16x32xf32>
    %1 = vector.extract_strided_slice %0 {offsets = [0, 0, 0], sizes = [2, 15, 32], strides = [1, 1, 1]} : vector<2x16x32xf32> to vector<2x15x32xf32>
    %2 = vector.extract_strided_slice %0 {offsets = [0, 1, 0], sizes = [2, 15, 32], strides = [1, 1, 1]} : vector<2x16x32xf32> to vector<2x15x32xf32>
    %3 = tpu.concatenate %1, %2 in 2 : vector<2x15x32xf32>, vector<2x15x32xf32> -> vector<2x15x64xf32>
    %4 = vector.shape_cast %3 : vector<2x15x64xf32> to vector<30x64xf32>
    %c0_2 = arith.constant 0 : index
    %c0_3 = arith.constant 0 : index
    %5 = vector.load %arg2[%c0_2, %c0_3] : memref<64x128xf32, #tpu.memory_space<vmem>>, vector<64x128xf32>
    %cst = arith.constant dense<0.000000e+00> : vector<30x128xf32>
    %6 = tpu.matmul %4, %5, %cst {dimension_numbers = #tpu.dot_dimension_numbers<[1], [0], [0], [1], [0, 0, 1, 1], [], []>} : vector<30x64xf32>, vector<64x128xf32>, vector<30x128xf32> -> vector<30x128xf32>
    %7 = vector.shape_cast %6 : vector<30x128xf32> to vector<2x15x128xf32>
    %cst_4 = arith.constant dense<0xFF800000> : vector<2x128xf32>
    %8 = vector.multi_reduction <maximumf>, %7, %cst_4 [1] : vector<2x15x128xf32> to vector<2x128xf32>
    %9 = vector.extract_strided_slice %0 {offsets = [0, 0, 0], sizes = [2, 14, 32], strides = [1, 1, 1]} : vector<2x16x32xf32> to vector<2x14x32xf32>
    %10 = vector.extract_strided_slice %0 {offsets = [0, 1, 0], sizes = [2, 14, 32], strides = [1, 1, 1]} : vector<2x16x32xf32> to vector<2x14x32xf32>
    %11 = vector.extract_strided_slice %0 {offsets = [0, 2, 0], sizes = [2, 14, 32], strides = [1, 1, 1]} : vector<2x16x32xf32> to vector<2x14x32xf32>
    %12 = tpu.concatenate %9, %10, %11 in 2 : vector<2x14x32xf32>, vector<2x14x32xf32>, vector<2x14x32xf32> -> vector<2x14x96xf32>
    %13 = vector.shape_cast %12 : vector<2x14x96xf32> to vector<28x96xf32>
    %c0_5 = arith.constant 0 : index
    %c0_6 = arith.constant 0 : index
    %14 = vector.load %arg3[%c0_5, %c0_6] : memref<96x128xf32, #tpu.memory_space<vmem>>, vector<96x128xf32>
    %cst_7 = arith.constant dense<0.000000e+00> : vector<28x128xf32>
    %15 = tpu.matmul %13, %14, %cst_7 {dimension_numbers = #tpu.dot_dimension_numbers<[1], [0], [0], [1], [0, 0, 1, 1], [], []>} : vector<28x96xf32>, vector<96x128xf32>, vector<28x128xf32> -> vector<28x128xf32>
    %16 = vector.shape_cast %15 : vector<28x128xf32> to vector<2x14x128xf32>
    %cst_8 = arith.constant dense<0xFF800000> : vector<2x128xf32>
    %17 = vector.multi_reduction <maximumf>, %16, %cst_8 [1] : vector<2x14x128xf32> to vector<2x128xf32>
    %18 = vector.extract_strided_slice %0 {offsets = [0, 0, 0], sizes = [2, 13, 32], strides = [1, 1, 1]} : vector<2x16x32xf32> to vector<2x13x32xf32>
    %19 = vector.extract_strided_slice %0 {offsets = [0, 1, 0], sizes = [2, 13, 32], strides = [1, 1, 1]} : vector<2x16x32xf32> to vector<2x13x32xf32>
    %20 = vector.extract_strided_slice %0 {offsets = [0, 2, 0], sizes = [2, 13, 32], strides = [1, 1, 1]} : vector<2x16x32xf32> to vector<2x13x32xf32>
    %21 = vector.extract_strided_slice %0 {offsets = [0, 3, 0], sizes = [2, 13, 32], strides = [1, 1, 1]} : vector<2x16x32xf32> to vector<2x13x32xf32>
    %22 = tpu.concatenate %18, %19, %20, %21 in 2 : vector<2x13x32xf32>, vector<2x13x32xf32>, vector<2x13x32xf32>, vector<2x13x32xf32> -> vector<2x13x128xf32>
    %23 = vector.shape_cast %22 : vector<2x13x128xf32> to vector<26x128xf32>
    %c0_9 = arith.constant 0 : index
    %c0_10 = arith.constant 0 : index
    %24 = vector.load %arg4[%c0_9, %c0_10] : memref<128x128xf32, #tpu.memory_space<vmem>>, vector<128x128xf32>
    %cst_11 = arith.constant dense<0.000000e+00> : vector<26x128xf32>
    %25 = tpu.matmul %23, %24, %cst_11 {dimension_numbers = #tpu.dot_dimension_numbers<[1], [0], [0], [1], [0, 0, 1, 1], [], []>} : vector<26x128xf32>, vector<128x128xf32>, vector<26x128xf32> -> vector<26x128xf32>
    %26 = vector.shape_cast %25 : vector<26x128xf32> to vector<2x13x128xf32>
    %cst_12 = arith.constant dense<0xFF800000> : vector<2x128xf32>
    %27 = vector.multi_reduction <maximumf>, %26, %cst_12 [1] : vector<2x13x128xf32> to vector<2x128xf32>
    %28 = tpu.concatenate %8, %17, %27 in 1 : vector<2x128xf32>, vector<2x128xf32>, vector<2x128xf32> -> vector<2x384xf32>
    %c0_13 = arith.constant 0 : index
    %c0_14 = arith.constant 0 : index
    %29 = vector.load %arg5[%c0_13, %c0_14] : memref<1x384xf32, #tpu.memory_space<vmem>>, vector<1x384xf32>
    %30 = vector.broadcast %29 : vector<1x384xf32> to vector<2x384xf32>
    %31 = arith.addf %28, %30 : vector<2x384xf32>
    %cst_15 = arith.constant 0.000000e+00 : f32
    %32 = vector.broadcast %cst_15 : f32 to vector<2x384xf32>
    %33 = arith.maximumf %31, %32 : vector<2x384xf32>
    %c0_16 = arith.constant 0 : index
    %c0_17 = arith.constant 0 : index
    %34 = vector.load %arg6[%c0_16, %c0_17] : memref<384x128xf32, #tpu.memory_space<vmem>>, vector<384x128xf32>
    %cst_18 = arith.constant dense<0.000000e+00> : vector<2x128xf32>
    %35 = tpu.matmul %33, %34, %cst_18 {dimension_numbers = #tpu.dot_dimension_numbers<[1], [0], [0], [1], [0, 0, 1, 1], [], []>} : vector<2x384xf32>, vector<384x128xf32>, vector<2x128xf32> -> vector<2x128xf32>
    %c0_19 = arith.constant 0 : index
    %c0_20 = arith.constant 0 : index
    %36 = vector.load %arg7[%c0_19, %c0_20] : memref<1x128xf32, #tpu.memory_space<vmem>>, vector<1x128xf32>
    %37 = vector.broadcast %36 : vector<1x128xf32> to vector<2x128xf32>
    %38 = arith.addf %35, %37 : vector<2x128xf32>
    %c0_21 = arith.constant 0 : index
    %c0_22 = arith.constant 0 : index
    %39 = vector.load %arg8[%c0_21, %c0_22] : memref<2x128xf32, #tpu.memory_space<vmem>>, vector<2x128xf32>
    tpu.vector_store %arg8[%c0_21, %c0_22], %38 {strides = array<i32>} : memref<2x128xf32, #tpu.memory_space<vmem>>, vector<2x128xf32>,
    return
  }
  func.func @transform_0(%arg0: i32) -> (i32, i32, i32) {
    %c0_i32 = arith.constant 0 : i32
    %c0_i32_0 = arith.constant 0 : i32
    %c0_i32_1 = arith.constant 0 : i32
    return %arg0, %c0_i32, %c0_i32_0 : i32, i32, i32
  }
  func.func @transform_1(%arg0: i32) -> (i32, i32) {
    %c0_i32 = arith.constant 0 : i32
    %c0_i32_0 = arith.constant 0 : i32
    %c0_i32_1 = arith.constant 0 : i32
    return %c0_i32, %c0_i32_0 : i32, i32
  }
  func.func @transform_2(%arg0: i32) -> (i32, i32) {
    %c0_i32 = arith.constant 0 : i32
    %c0_i32_0 = arith.constant 0 : i32
    %c0_i32_1 = arith.constant 0 : i32
    return %c0_i32, %c0_i32_0 : i32, i32
  }
  func.func @transform_3(%arg0: i32) -> (i32, i32) {
    %c0_i32 = arith.constant 0 : i32
    %c0_i32_0 = arith.constant 0 : i32
    %c0_i32_1 = arith.constant 0 : i32
    return %c0_i32, %c0_i32_0 : i32, i32
  }
  func.func @transform_4(%arg0: i32) -> (i32, i32) {
    %c0_i32 = arith.constant 0 : i32
    %c0_i32_0 = arith.constant 0 : i32
    %c0_i32_1 = arith.constant 0 : i32
    return %c0_i32, %c0_i32_0 : i32, i32
  }
  func.func @transform_5(%arg0: i32) -> (i32, i32) {
    %c0_i32 = arith.constant 0 : i32
    %c0_i32_0 = arith.constant 0 : i32
    %c0_i32_1 = arith.constant 0 : i32
    return %c0_i32, %c0_i32_0 : i32, i32
  }
  func.func @transform_6(%arg0: i32) -> (i32, i32) {
    %c0_i32 = arith.constant 0 : i32
    %c0_i32_0 = arith.constant 0 : i32
    %c0_i32_1 = arith.constant 0 : i32
    return %c0_i32, %c0_i32_0 : i32, i32
  }
  func.func @transform_7(%arg0: i32) -> (i32, i32) {
    %c0_i32 = arith.constant 0 : i32
    %c0_i32_0 = arith.constant 0 : i32
    return %arg0, %c0_i32 : i32, i32
  }
}

</mosaic_0001>

<bundles_post_ra>
// kernel: tpu_custom_call.1
= control target key start
LH: loop header
LB: loop body
LE: loop exit
PB: predicated region body
PF: predicated region fallthrough
CT: control target
= control target key end

     0   :  { %12 = vsyncpa [#allocation3], 0  ;;  %s1226_s0 = inlined_call_operand.hbm [shape: f32[2,16,32], index: 0, kind: input, shape index: {}]   ;;  %s1227_s1 = inlined_call_operand.hbm [shape: f32[64,128], index: 1, kind: input, shape index: {}]   ;;  %s1228_s2 = inlined_call_operand.hbm [shape: f32[96,128], index: 2, kind: input, shape index: {}]   ;;  %s1229_s3 = inlined_call_operand.hbm [shape: f32[128,128], index: 3, kind: input, shape index: {}]   ;;  %s1230_s4 = inlined_call_operand.vmem [shape: f32[1,384], index: 4, kind: input, shape index: {}]   ;;  %s1231_s5 = inlined_call_operand.hbm [shape: f32[384,128], index: 5, kind: input, shape index: {}]   ;;  %s1232_s6 = inlined_call_operand.vmem [shape: f32[1,128], index: 6, kind: input, shape index: {}]   ;;  %s1233_s7 = inlined_call_operand.hbm [shape: f32[2,128], index: 7, kind: output, shape index: {}]  }
   0x1   :  { %13 = vsyncpa [#allocation6], 0 }
   0x2   :  { %14 = vsyncpa [#allocation9], 0 }
   0x3   :  { %15 = vsyncpa [#allocation4], 0  ;;  %s33_s26 = sshll.u32 %s1227_s1, 4  ;;  %s1064_s27 = smov [#allocation5]   ;;  %s34_s26 = int_to_ptr.hbm [resolvable:$true] %s33_s26 }
   0x4   :  { %s35_s28 = sshll.u32 %s1064_s27, 4  ;;  %s59_s8 = sshll.u32 %s1229_s3, 4  ;;  %s36_s28 = int_to_ptr.vmem [resolvable:$true] %s35_s28  ;;  %s60_s8 = int_to_ptr.hbm [resolvable:$true] %s59_s8 }
   0x5   :  { %s1065_s9 = smov 128   ;;  %s1066_s10 = smov 8  }
   0x6   :  { %41 = dma.hbm_to_vmem [thread:$0]  %s34_s26, 1024, %s36_s28, [#allocation6], %s1065_s9, %s1065_s9, %s1066_s10  }
   0x7   :  { %s1067_s11 = smov [#allocation8]   ;;  %s20_s15 = sshll.u32 %s1226_s0, 4  ;;  %s21_s15 = int_to_ptr.hbm [resolvable:$true] %s20_s15 }
   0x8   :  { %s61_s12 = sshll.u32 %s1067_s11, 4  ;;  %s46_s17 = sshll.u32 %s1228_s2, 4  ;;  %s62_s12 = int_to_ptr.vmem [resolvable:$true] %s61_s12  ;;  %s47_s17 = int_to_ptr.hbm [resolvable:$true] %s46_s17 }
   0x9   :  { %67 = dma.hbm_to_vmem [thread:$0]  %s60_s8, 2048, %s62_s12, [#allocation9], %s1065_s9, %s1065_s9, %s1066_s10  }
   0xa   :  { %s1068_s18 = smov [#allocation2]   ;;  %s1069_s3 = smov [#allocation7]  }
   0xb   :  { %s22_s19 = sshll.u32 %s1068_s18, 4  ;;  %s48_s20 = sshll.u32 %s1069_s3, 4  ;;  %s23_s19 = int_to_ptr.vmem [resolvable:$true] %s22_s19  ;;  %s49_s20 = int_to_ptr.vmem [resolvable:$true] %s48_s20 }
   0xc   :  { %28 = dma.hbm_to_vmem [thread:$0]  %s21_s15, 512, %s23_s19, [#allocation3], %s1065_s9, %s1065_s9, %s1066_s10  }
   0xd   :  { %s74_s23 = sshll.u32 %s1231_s5, 4  ;;  %s1070_s0 = smov [#allocation10]   ;;  %s75_s23 = int_to_ptr.hbm [resolvable:$true] %s74_s23 }
   0xe   :  { %54 = dma.hbm_to_vmem [thread:$0]  %s47_s17, 1536, %s49_s20, [#allocation6], %s1065_s9, %s1065_s9, %s1066_s10  }
   0xf   :  { %s76_s24 = sshll.u32 %s1070_s0, 4  ;;  %s77_s24 = int_to_ptr.vmem [resolvable:$true] %s76_s24 }
  0x10   :  { %82 = dma.hbm_to_vmem [thread:$0]  %s75_s23, 6144, %s77_s24, [#allocation9], %s1065_s9, %s1065_s9, %s1066_s10  }
  0x11   :  { %1056 = dma.done.wait [#allocation3], 512  }
  0x12   :  { %1057 = vsyncadd [#allocation3], 4294966784 }
  0x13   :  { %1058 = dma.done.wait [#allocation6], 2560  }
  0x14   :  { %1059 = vsyncadd [#allocation6], 4294964736 }
  0x15   :  { %1060 = dma.done.wait [#allocation9], 8192  }
  0x16   :  { %1061 = vsyncadd [#allocation9], 4294959104  ;;  %v1130_v0 = vld [vmem:[#allocation2 + $0x10] sm:$0xff]  ;;  %v1132_v1 = vld [vmem:[#allocation2 + $0x18] sm:$0xff]  ;;  %vm113_vm0 = vcmask 1046528   ;;  %vm345_vm1 = vcmask 1045504  }
  0x17   :  { %v105_v2 = vld [vmem:[#allocation2] sm:$0xff]  ;;  %v117_v3 = vrot.slane %v1130_v0, 1  ;;  %v118_v4 = vrot.slane %v1132_v1, 1  ;;  %v1136_v5 = vld [vmem:[#allocation2 + $0x8] sm:$0xff]  ;;  %s1071_s2 = smov 32   ;;  %s1072_s5 = smov 64  }
  0x18   :  { %v114_v6 = vrot.slane %v105_v2, 1  ;;  %v346_v7 = vrot.slane %v105_v2, 2  ;;  %v115_v8 = vrot.slane %v1136_v5, 1  ;;  %v347_v9 = vrot.slane %v1136_v5, 2  ;;  %s1073_s25 = smov 96   ;;  %v174_v22 = vld [vmem:[#allocation5 + $0x38] sm:$0xff] }
  0x19   :  { %v119_v10 = vsel %vm113_vm0, %v117_v3, %v118_v4  ;;  %v350_v13 = vrot.slane %v1132_v1, 2  ;;  %v349_v14 = vrot.slane %v1130_v0, 2  ;;  %v517_v15 = vrot.slane %v1136_v5, 3  ;;  %v173_v23 = vld [vmem:[#allocation5 + $0x30] sm:$0xff]  ;;  %233 = vmatpush.msra.mxu0 %v174_v22  ;;  %v172_v24 = vld [vmem:[#allocation5 + $0x28] sm:$0xff]  ;;  %v171_v25 = vld [vmem:[#allocation5 + $0x20] sm:$0xff] }
  0x1a   :  { %124 = vrot.lane.b32.xlu1 %v119_v10, %s1071_s2  ;;  %v116_v11 = vsel %vm113_vm0, %v114_v6, %v115_v8  ;;  %v348_v12 = vsel %vm345_vm1, %v346_v7, %v347_v9  ;;  %v516_v16 = vrot.slane %v105_v2, 3  ;;  %vm515_vm2 = vcmask 1044480   ;;  %v170_v26 = vld [vmem:[#allocation5 + $0x18] sm:$0xff]  ;;  %v169_v27 = vld [vmem:[#allocation5 + $0x10] sm:$0xff]  ;;  %v168_v32 = vld [vmem:[#allocation5 + $0x8] sm:$0xff]  ;;  %s1074_s29 = smov [#allocation11]  }
  0x1b   :  { %120 = vrot.lane.b32.xlu0 %v116_v11, %s1071_s2  ;;  %352 = vrot.lane.b32.xlu2 %v348_v12, %s1072_s5  ;;  %v351_v17 = vsel %vm345_vm1, %v349_v14, %v350_v13  ;;  %v519_v19 = vrot.slane %v1130_v0, 3  ;;  %v520_v20 = vrot.slane %v1132_v1, 3  ;;  %vm132_vm3 = vcmask 261120   ;;  %v167_v38 = vld [vmem:[#allocation5] sm:$0xff]  ;;  %s878_s30 = sshll.u32 %s1074_s29, 4  ;;  %s880_s10 = sshll.u32 %s1233_s7, 4  ;;  %s879_s30 = int_to_ptr.vmem [resolvable:$true] %s878_s30  ;;  %s881_s10 = int_to_ptr.hbm [resolvable:$true] %s880_s10 }
  0x1c   :  { %v518_v18 = vsel %vm515_vm2, %v516_v16, %v517_v15  ;;  %234 = vmatpush.msra.mxu0 %v173_v23  ;;  %vm216_vm4 = vcmask 523264   ;;  %vm419_vm5 = vcmask 785408   ;;  %vm735_vm6 = vcmask 1041409  }
  0x1d   :  { %v521_v21 = vsel %vm515_vm2, %v519_v19, %v520_v20 }
  0x1e   :  { %235 = vmatpush.msra.mxu0 %v172_v24 }
  0x20   :  { %236 = vmatpush.msra.mxu0 %v171_v25 }
  0x22   :  { %126 = vrot.lane.b32.xlu1 %v118_v4, %s1071_s2  ;;  %237 = vmatpush.msra.mxu0 %v170_v26 }
  0x23   :  { %122 = vrot.lane.b32.xlu0 %v115_v8, %s1071_s2  ;;  %354 = vrot.lane.b32.xlu2 %v347_v9, %s1072_s5 }
  0x24   :  { %238 = vmatpush.msra.mxu0 %v169_v27 }
  0x26   :  { %239 = vmatpush.msra.mxu0 %v168_v32  ;;  %v390_v32 = vld [vmem:[#allocation7 + $0x40] sm:$0xff] }
  0x28   :  { %240 = vmatpush.msra.mxu0 %v167_v38  ;;  %v772_v38 = vld [vmem:[#allocation10 + $0x60] sm:$0xff] }
  0x2a   :  { %358 = vrot.lane.b32.xlu1 %v350_v13, %s1072_s5 }
  0x2b   :  { %356 = vrot.lane.b32.xlu0 %v351_v17, %s1072_s5  ;;  %522 = vrot.lane.b32.xlu2 %v518_v18, %s1073_s25 }
  0x32   :  { %526 = vrot.lane.b32.xlu1 %v521_v21, %s1073_s25  ;;  %v392_v21 = vld [vmem:[#allocation7 + $0x50] sm:$0xff] }
  0x33   :  { %524 = vrot.lane.b32.xlu0 %v517_v15, %s1073_s25  ;;  %528 = vrot.lane.b32.xlu2 %v520_v20, %s1073_s25  ;;  %v393_v20 = vld [vmem:[#allocation7 + $0x58] sm:$0xff] }
  0x34   :  { %432 = vmatpush.msra.mxu1 %v393_v20 }
  0x36   :  { %433 = vmatpush.msra.mxu1 %v392_v21 }
  0x75   :  { %v353_v30 = vpop.permute.xlu2 %352 }
  0x7d   :  { %v355_v45 = vpop.permute.xlu2 %354 }
  0x8c   :  { %v125_v28 = vpop.permute.xlu1 %124 }
  0x8d   :  { %v121_v29 = vpop.permute.xlu0 %120  ;;  %v135_v49 = vsel %vm132_vm3, %v1130_v0, %v125_v28 }
  0x8e   :  { %v133_v31 = vsel %vm132_vm3, %v105_v2, %v121_v29  ;;  %v154_v60 = vrot.slane %v135_v49, 1  ;;  %v155_v61 = vrot.slane %v135_v49, 2  ;;  %v156_v63 = vrot.slane %v135_v49, 3 }
  0x8f   :  { %v141_v33 = vrot.slane %v133_v31, 1  ;;  %v142_v34 = vrot.slane %v133_v31, 2  ;;  %v143_v35 = vrot.slane %v133_v31, 3  ;;  %175 = vst [vmem:[#allocation1] ss:$9 sm:$0xff] %v133_v31  ;;  %v144_v36 = vrot.slane %v133_v31, 4 }
  0x90   :  { %v1153_v37 = vsel %vm216_vm4, %v133_v31, %v353_v30  ;;  %v145_v39 = vrot.slane %v133_v31, 5  ;;  %v146_v40 = vrot.slane %v133_v31, 6  ;;  %v147_v41 = vrot.slane %v133_v31, 7  ;;  %v391_v30 = vld [vmem:[#allocation7 + $0x48] sm:$0xff]  ;;  %v775_v31 = vld [vmem:[#allocation10 + $0x78] sm:$0xff] }
  0x91   :  { %177 = vst [vmem:[#allocation1 + $0x1] ss:$9 sm:$0xff] %v141_v33  ;;  %v157_v0 = vrot.slane %v135_v49, 4  ;;  %v159_v2 = vrot.slane %v135_v49, 6  ;;  %v160_v3 = vrot.slane %v135_v49, 7  ;;  %434 = vmatpush.msra.mxu1 %v391_v30  ;;  %812 = vmatpush.msra.mxu3 %v775_v31  ;;  %v774_v33 = vld [vmem:[#allocation10 + $0x70] sm:$0xff] }
  0x92   :  { %179 = vst [vmem:[#allocation1 + $0x2] ss:$9 sm:$0xff] %v142_v34  ;;  %v389_v34 = vld [vmem:[#allocation7 + $0x38] sm:$0xff]  ;;  %v373_v21 = vrot.slane %v1153_v37, 4 }
  0x93   :  { %181 = vst [vmem:[#allocation1 + $0x3] ss:$9 sm:$0xff] %v143_v35  ;;  %435 = vmatpush.msra.mxu1 %v390_v32  ;;  %813 = vmatpush.msra.mxu3 %v774_v33  ;;  %v773_v35 = vld [vmem:[#allocation10 + $0x68] sm:$0xff] }
  0x94   :  { %v127_v42 = vpop.permute.xlu1 %126  ;;  %183 = vst [vmem:[#allocation1 + $0x4] ss:$9 sm:$0xff] %v144_v36  ;;  %v388_v36 = vld [vmem:[#allocation7 + $0x30] sm:$0xff] }
  0x95   :  { %v123_v43 = vpop.permute.xlu0 %122  ;;  %185 = vst [vmem:[#allocation1 + $0x5] ss:$9 sm:$0xff] %v145_v39  ;;  %v136_v47 = vsel %vm132_vm3, %v1132_v1, %v127_v42  ;;  %v158_v1 = vrot.slane %v135_v49, 5  ;;  %436 = vmatpush.msra.mxu1 %v389_v34  ;;  %814 = vmatpush.msra.mxu3 %v773_v35  ;;  %v387_v42 = vld [vmem:[#allocation7 + $0x28] sm:$0xff] }
  0x96   :  { %187 = vst [vmem:[#allocation1 + $0x6] ss:$9 sm:$0xff] %v146_v40  ;;  %v134_v44 = vsel %vm132_vm3, %v1136_v5, %v123_v43  ;;  %v161_v4 = vrot.slane %v136_v47, 1  ;;  %v162_v5 = vrot.slane %v136_v47, 2  ;;  %v163_v7 = vrot.slane %v136_v47, 3  ;;  %v771_v43 = vld [vmem:[#allocation10 + $0x58] sm:$0xff] }
  0x97   :  { %189 = vst [vmem:[#allocation1 + $0x7] ss:$9 sm:$0xff] %v147_v41  ;;  %v1158_v46 = vsel %vm216_vm4, %v134_v44, %v355_v45  ;;  %v148_v52 = vrot.slane %v134_v44, 1  ;;  %v149_v55 = vrot.slane %v134_v44, 2  ;;  %v150_v56 = vrot.slane %v134_v44, 3  ;;  %437 = vmatpush.msra.mxu1 %v388_v36  ;;  %815 = vmatpush.msra.mxu3 %v772_v38 }
  0x98   :  { %v151_v57 = vrot.slane %v134_v44, 4  ;;  %v152_v58 = vrot.slane %v134_v44, 5  ;;  %v153_v59 = vrot.slane %v134_v44, 6  ;;  %v164_v8 = vrot.slane %v136_v47, 4  ;;  %v1193_v36 = vld [vmem:[%s1230_s4] sm:$0x7] }
  0x99   :  { %v165_v9 = vrot.slane %v136_v47, 5  ;;  %v166_v10 = vrot.slane %v136_v47, 6  ;;  %438 = vmatpush.msra.mxu1 %v387_v42  ;;  %816 = vmatpush.msra.mxu3 %v771_v43  ;;  %v748_v42 = vperm.slane %v1193_v36, 0 }
  0x9c   :  { %v359_v48 = vpop.permute.xlu1 %358 }
  0x9d   :  { %v1165_v50 = vsel %vm216_vm4, %v136_v47, %v359_v48  ;;  %v357_v51 = vpop.permute.xlu0 %356 }
  0x9e   :  { %v1168_v53 = vsel %vm216_vm4, %v135_v49, %v357_v51  ;;  %v190_v54 = vld [vmem:[#allocation1] sm:$0xff]  ;;  %v386_v51 = vld [vmem:[#allocation7 + $0x20] sm:$0xff] }
  0x9f   :  { %198 = vst [vmem:[#allocation1 + $0x7] ss:$9 sm:$0xff] %v135_v49  ;;  %892 = vmatmul.msk.f32.vlgmr.msra.gmra.mxu0 %vm216_vm4, %v190_v54  ;;  %439 = vmatpush.msra.mxu1 %v386_v51  ;;  %v377_v33 = vrot.slane %v1168_v53, 2  ;;  %v378_v38 = vrot.slane %v1168_v53, 4 }
  0xa0   :  { %191 = vst [vmem:[#allocation1] ss:$9 sm:$0xff] %v134_v44 }
  0xa1   :  { %192 = vst [vmem:[#allocation1 + $0x1] ss:$9 sm:$0xff] %v148_v52  ;;  %v770_v52 = vld [vmem:[#allocation10 + $0x50] sm:$0xff] }
  0xa2   :  { %193 = vst [vmem:[#allocation1 + $0x2] ss:$9 sm:$0xff] %v149_v55  ;;  %817 = vmatpush.msra.mxu3 %v770_v52  ;;  %v385_v55 = vld [vmem:[#allocation7 + $0x18] sm:$0xff] }
  0xa3   :  { %194 = vst [vmem:[#allocation1 + $0x3] ss:$9 sm:$0xff] %v150_v56  ;;  %v769_v56 = vld [vmem:[#allocation10 + $0x48] sm:$0xff]  ;;  %440 = vmatpush.msra.mxu1 %v385_v55  ;;  %v579_v52 = vld [vmem:[#allocation8 + $0x78] sm:$0xff] }
  0xa4   :  { %195 = vst [vmem:[#allocation1 + $0x4] ss:$9 sm:$0xff] %v151_v57  ;;  %818 = vmatpush.msra.mxu3 %v769_v56  ;;  %v384_v57 = vld [vmem:[#allocation7 + $0x10] sm:$0xff]  ;;  %621 = vmatpush.msra.mxu2 %v579_v52  ;;  %v577_v55 = vld [vmem:[#allocation8 + $0x68] sm:$0xff]  ;;  %v576_v56 = vld [vmem:[#allocation8 + $0x60] sm:$0xff] }
  0xa5   :  { %196 = vst [vmem:[#allocation1 + $0x5] ss:$9 sm:$0xff] %v152_v58  ;;  %v768_v58 = vld [vmem:[#allocation10 + $0x40] sm:$0xff]  ;;  %441 = vmatpush.msra.mxu1 %v384_v57  ;;  %v575_v57 = vld [vmem:[#allocation8 + $0x58] sm:$0xff] }
  0xa6   :  { %197 = vst [vmem:[#allocation1 + $0x6] ss:$9 sm:$0xff] %v153_v59  ;;  %819 = vmatpush.msra.mxu3 %v768_v58  ;;  %v383_v59 = vld [vmem:[#allocation7 + $0x8] sm:$0xff]  ;;  %v574_v58 = vld [vmem:[#allocation8 + $0x50] sm:$0xff] }
  0xa7   :  { %442 = vmatpush.msra.mxu1 %v383_v59 }
  0xad   :  { %v199_v62 = vld [vmem:[#allocation1] sm:$0xff] }
  0xae   :  { %200 = vst [vmem:[#allocation1] ss:$9 sm:$0xff] %v154_v60  ;;  %893 = vmatmul.msk.f32.gmra.mxu0 %vm216_vm4, %v199_v62  ;;  %v767_v60 = vld [vmem:[#allocation10 + $0x38] sm:$0xff]  ;;  %v766_v62 = vld [vmem:[#allocation10 + $0x30] sm:$0xff] }
  0xaf   :  { %201 = vst [vmem:[#allocation1 + $0x1] ss:$9 sm:$0xff] %v155_v61  ;;  %820 = vmatpush.msra.mxu3 %v767_v60  ;;  %v382_v61 = vld [vmem:[#allocation7] sm:$0xff] }
  0xb0   :  { %202 = vst [vmem:[#allocation1 + $0x2] ss:$9 sm:$0xff] %v156_v63  ;;  %443 = vmatpush.msra.mxu1 %v382_v61  ;;  %v765_v63 = vld [vmem:[#allocation10 + $0x28] sm:$0xff] }
  0xb1   :  { %203 = vst [vmem:[#allocation1 + $0x3] ss:$9 sm:$0xff] %v157_v0  ;;  %821 = vmatpush.msra.mxu3 %v766_v62 }
  0xb2   :  { %204 = vst [vmem:[#allocation1 + $0x4] ss:$9 sm:$0xff] %v158_v1 }
  0xb3   :  { %205 = vst [vmem:[#allocation1 + $0x5] ss:$9 sm:$0xff] %v159_v2  ;;  %822 = vmatpush.msra.mxu3 %v765_v63 }
  0xb4   :  { %206 = vst [vmem:[#allocation1 + $0x6] ss:$9 sm:$0xff] %v160_v3  ;;  %v764_v3 = vld [vmem:[#allocation10 + $0x20] sm:$0xff] }
  0xb5   :  { %207 = vst [vmem:[#allocation1 + $0x7] ss:$9 sm:$0xff] %v136_v47  ;;  %823 = vmatpush.msra.mxu3 %v764_v3  ;;  %v573_v3 = vld [vmem:[#allocation8 + $0x48] sm:$0xff] }
  0xbc   :  { %v208_v6 = vld [vmem:[#allocation1] sm:$0xff] }
  0xbd   :  { %209 = vst [vmem:[#allocation1] ss:$9 sm:$0xff] %v161_v4  ;;  %894 = vmatmul.msk.f32.gmra.mxu0 %vm216_vm4, %v208_v6 }
  0xbe   :  { %210 = vst [vmem:[#allocation1 + $0x1] ss:$9 sm:$0xff] %v162_v5 }
  0xbf   :  { %211 = vst [vmem:[#allocation1 + $0x2] ss:$9 sm:$0xff] %v163_v7 }
  0xc0   :  { %212 = vst [vmem:[#allocation1 + $0x3] ss:$9 sm:$0xff] %v164_v8  ;;  %v763_v8 = vld [vmem:[#allocation10 + $0x18] sm:$0xff] }
  0xc1   :  { %213 = vst [vmem:[#allocation1 + $0x4] ss:$9 sm:$0xff] %v165_v9  ;;  %824 = vmatpush.msra.mxu3 %v763_v8  ;;  %v571_v8 = vld [vmem:[#allocation8 + $0x38] sm:$0xff] }
  0xc2   :  { %214 = vst [vmem:[#allocation1 + $0x5] ss:$9 sm:$0xff] %v166_v10 }
  0xc9   :  { %v215_v11 = vld [vmem:[#allocation1] sm:$0xff] }
  0xca   :  { %895 = vmatmul.msk.f32.gmra.mxu0 %vm216_vm4, %v215_v11  ;;  %v762_v11 = vld [vmem:[#allocation10 + $0x10] sm:$0xff] }
  0xcb   :  { %825 = vmatpush.msra.mxu3 %v762_v11 }
 0x11c   :  { %v242_v12 = vpop.f32.mrf.mxu0 }
 0x11d   :  { %v258_v13 = vrot.slane %v242_v12, 1  ;;  %v259_v14 = vrot.slane %v242_v12, 2  ;;  %v260_v15 = vrot.slane %v242_v12, 3  ;;  %284 = vst [vmem:[#allocation1] ss:$9 sm:$0xff] %v242_v12  ;;  %v261_v16 = vrot.slane %v242_v12, 4 }
 0x11e   :  { %v262_v17 = vrot.slane %v242_v12, 5  ;;  %v263_v18 = vrot.slane %v242_v12, 6  ;;  %v264_v19 = vrot.slane %v242_v12, 7 }
 0x11f   :  { %286 = vst [vmem:[#allocation1 + $0x1] ss:$9 sm:$0xff] %v258_v13  ;;  %v761_v13 = vld [vmem:[#allocation10 + $0x8] sm:$0xff] }
 0x120   :  { %288 = vst [vmem:[#allocation1 + $0x2] ss:$9 sm:$0xff] %v259_v14  ;;  %v760_v14 = vld [vmem:[#allocation10] sm:$0xff]  ;;  %826 = vmatpush.msra.mxu3 %v761_v13 }
 0x121   :  { %290 = vst [vmem:[#allocation1 + $0x3] ss:$9 sm:$0xff] %v260_v15  ;;  %v375_v15 = vrot.slane %v1158_v46, 2 }
 0x122   :  { %292 = vst [vmem:[#allocation1 + $0x4] ss:$9 sm:$0xff] %v261_v16  ;;  %v376_v16 = vrot.slane %v1158_v46, 4  ;;  %827 = vmatpush.msra.mxu3 %v760_v14  ;;  %v570_v14 = vld [vmem:[#allocation8 + $0x30] sm:$0xff] }
 0x123   :  { %294 = vst [vmem:[#allocation1 + $0x5] ss:$9 sm:$0xff] %v262_v17 }
 0x124   :  { %296 = vst [vmem:[#allocation1 + $0x6] ss:$9 sm:$0xff] %v263_v18 }
 0x125   :  { %298 = vst [vmem:[#allocation1 + $0x7] ss:$9 sm:$0xff] %v264_v19  ;;  %v372_v19 = vrot.slane %v1153_v37, 2 }
 0x12b   :  { %v245_v22 = vpop.f32.mrf.mxu0 }
 0x12c   :  { %v1174_v23 = vld [vmem:[#allocation1] sm:$0xff]  ;;  %v265_v24 = vrot.slane %v245_v22, 1  ;;  %v266_v25 = vrot.slane %v245_v22, 2  ;;  %v267_v26 = vrot.slane %v245_v22, 3  ;;  %v268_v27 = vrot.slane %v245_v22, 4 }
 0x12d   :  { %300 = vst [vmem:[#allocation1] ss:$9 sm:$0xff] %v245_v22  ;;  %v269_v28 = vrot.slane %v245_v22, 5  ;;  %v270_v29 = vrot.slane %v245_v22, 6  ;;  %v271_v39 = vrot.slane %v245_v22, 7 }
 0x12e   :  { %301 = vst [vmem:[#allocation1 + $0x1] ss:$9 sm:$0xff] %v265_v24 }
 0x12f   :  { %302 = vst [vmem:[#allocation1 + $0x2] ss:$9 sm:$0xff] %v266_v25 }
 0x130   :  { %303 = vst [vmem:[#allocation1 + $0x3] ss:$9 sm:$0xff] %v267_v26  ;;  %v380_v26 = vrot.slane %v1165_v50, 2 }
 0x131   :  { %304 = vst [vmem:[#allocation1 + $0x4] ss:$9 sm:$0xff] %v268_v27  ;;  %v381_v27 = vrot.slane %v1165_v50, 4 }
 0x132   :  { %305 = vst [vmem:[#allocation1 + $0x5] ss:$9 sm:$0xff] %v269_v28 }
 0x133   :  { %306 = vst [vmem:[#allocation1 + $0x6] ss:$9 sm:$0xff] %v270_v29 }
 0x13a   :  { %v307_v40 = vld [vmem:[#allocation1] sm:$0xff]  ;;  %v248_v41 = vpop.f32.mrf.mxu0 }
 0x13b   :  { %308 = vst [vmem:[#allocation1] ss:$9 sm:$0xff] %v271_v39  ;;  %v272_v44 = vrot.slane %v248_v41, 1  ;;  %v273_v45 = vrot.slane %v248_v41, 2  ;;  %v274_v47 = vrot.slane %v248_v41, 3  ;;  %v275_v48 = vrot.slane %v248_v41, 4 }
 0x13c   :  { %309 = vst [vmem:[#allocation1 + $0x1] ss:$9 sm:$0xff] %v248_v41  ;;  %v276_v49 = vrot.slane %v248_v41, 5  ;;  %v277_v54 = vrot.slane %v248_v41, 6  ;;  %v278_v1 = vrot.slane %v248_v41, 7  ;;  %v329_v6 = vsel %vm113_vm0, %v307_v40, -inf }
 0x13d   :  { %310 = vst [vmem:[#allocation1 + $0x2] ss:$9 sm:$0xff] %v272_v44  ;;  %v330_v12 = vmax.f32 %v1174_v23, %v329_v6  ;;  %v374_v23 = vrot.slane %v1153_v37, 6  ;;  %v379_v40 = vrot.slane %v1168_v53, 6  ;;  %v572_v6 = vld [vmem:[#allocation8 + $0x40] sm:$0xff] }
 0x13e   :  { %311 = vst [vmem:[#allocation1 + $0x3] ss:$9 sm:$0xff] %v273_v45 }
 0x13f   :  { %312 = vst [vmem:[#allocation1 + $0x4] ss:$9 sm:$0xff] %v274_v47  ;;  %v331_v17 = vrot.slane %v330_v12, 4 }
 0x140   :  { %313 = vst [vmem:[#allocation1 + $0x5] ss:$9 sm:$0xff] %v275_v48 }
 0x141   :  { %314 = vst [vmem:[#allocation1 + $0x6] ss:$9 sm:$0xff] %v276_v49  ;;  %v332_v18 = vmax.f32 %v330_v12, %v331_v17  ;;  %v569_v17 = vld [vmem:[#allocation8 + $0x28] sm:$0xff] }
 0x142   :  { %315 = vst [vmem:[#allocation1 + $0x7] ss:$9 sm:$0xff] %v277_v54  ;;  %v578_v54 = vld [vmem:[#allocation8 + $0x70] sm:$0xff] }
 0x143   :  { %v333_v25 = vrot.slane %v332_v18, 2  ;;  %622 = vmatpush.msra.mxu2 %v578_v54  ;;  %v778_v54 = vld [vmem:[#allocation10 + $0x90] sm:$0xff] }
 0x145   :  { %v334_v30 = vmax.f32 %v332_v18, %v333_v25  ;;  %623 = vmatpush.msra.mxu2 %v577_v55  ;;  %v523_v18 = vpop.permute.xlu2 %522  ;;  %v785_v25 = vld [vmem:[#allocation10 + $0xc8] sm:$0xff] }
 0x147   :  { %v251_v0 = vpop.f32.mrf.mxu0  ;;  %v335_v34 = vrot.slane %v334_v30, 1  ;;  %624 = vmatpush.msra.mxu2 %v576_v56 }
 0x148   :  { %v279_v2 = vrot.slane %v251_v0, 1  ;;  %v280_v5 = vrot.slane %v251_v0, 2  ;;  %v281_v7 = vrot.slane %v251_v0, 3  ;;  %v282_v9 = vrot.slane %v251_v0, 4 }
 0x149   :  { %v316_v4 = vld [vmem:[#allocation1] sm:$0xff]  ;;  %v283_v10 = vrot.slane %v251_v0, 5  ;;  %v336_v43 = vmax.f32 %v334_v30, %v335_v34  ;;  %625 = vmatpush.msra.mxu2 %v575_v57  ;;  %v784_v30 = vld [vmem:[#allocation10 + $0xc0] sm:$0xff]  ;;  %v565_v34 = vld [vmem:[#allocation8 + $0x8] sm:$0xff] }
 0x14a   :  { %317 = vst [vmem:[#allocation1] ss:$9 sm:$0xff] %v278_v1 }
 0x14b   :  { %318 = vst [vmem:[#allocation1 + $0x1] ss:$9 sm:$0xff] %v251_v0  ;;  %626 = vmatpush.msra.mxu2 %v574_v58  ;;  %v777_v58 = vld [vmem:[#allocation10 + $0x88] sm:$0xff] }
 0x14c   :  { %319 = vst [vmem:[#allocation1 + $0x2] ss:$9 sm:$0xff] %v279_v2 }
 0x14d   :  { %320 = vst [vmem:[#allocation1 + $0x3] ss:$9 sm:$0xff] %v280_v5  ;;  %627 = vmatpush.msra.mxu2 %v573_v3 }
 0x14e   :  { %321 = vst [vmem:[#allocation1 + $0x4] ss:$9 sm:$0xff] %v281_v7  ;;  %v790_v7 = vld [vmem:[#allocation10 + $0xf0] sm:$0xff] }
 0x14f   :  { %322 = vst [vmem:[#allocation1 + $0x5] ss:$9 sm:$0xff] %v282_v9  ;;  %628 = vmatpush.msra.mxu2 %v572_v6  ;;  %v789_v9 = vld [vmem:[#allocation10 + $0xe8] sm:$0xff] }
 0x150   :  { %323 = vst [vmem:[#allocation1 + $0x6] ss:$9 sm:$0xff] %v283_v10 }
 0x151   :  { %402 = vst [vmem:[#allocation1 + $0x20] ss:$4 sm:$0xff] %v1158_v46  ;;  %629 = vmatpush.msra.mxu2 %v571_v8 }
 0x152   :  { %404 = vst [vmem:[#allocation1 + $0x21] ss:$4 sm:$0xff] %v375_v15  ;;  %v788_v15 = vld [vmem:[#allocation10 + $0xe0] sm:$0xff] }
 0x153   :  { %406 = vst [vmem:[#allocation1 + $0x22] ss:$4 sm:$0xff] %v376_v16  ;;  %630 = vmatpush.msra.mxu2 %v570_v14 }
 0x154   :  { %408 = vst [vmem:[#allocation1 + $0x23] ss:$4 sm:$0xff] %v1168_v53 }
 0x155   :  { %631 = vmatpush.msra.mxu2 %v569_v17 }
 0x157   :  { %v324_v20 = vld [vmem:[#allocation1] sm:$0xff] }
 0x158   :  { %394 = vst [vmem:[#allocation1] ss:$4 sm:$0xff] %v1153_v37  ;;  %v337_v22 = vsel %vm113_vm0, %v324_v20, -inf }
 0x159   :  { %396 = vst [vmem:[#allocation1 + $0x1] ss:$4 sm:$0xff] %v372_v19  ;;  %v338_v24 = vmax.f32 %v316_v4, %v337_v22  ;;  %v791_v4 = vld [vmem:[#allocation10 + $0xf8] sm:$0xff]  ;;  %v786_v22 = vld [vmem:[#allocation10 + $0xd0] sm:$0xff] }
 0x15a   :  { %398 = vst [vmem:[#allocation1 + $0x2] ss:$4 sm:$0xff] %v373_v21  ;;  %832 = vmatpush.msrb.mxu0 %v791_v4  ;;  %v787_v19 = vld [vmem:[#allocation10 + $0xd8] sm:$0xff]  ;;  %v568_v21 = vld [vmem:[#allocation8 + $0x20] sm:$0xff]  ;;  %v527_v4 = vpop.permute.xlu1 %526 }
 0x15b   :  { %400 = vst [vmem:[#allocation1 + $0x3] ss:$4 sm:$0xff] %v374_v23  ;;  %v410_v28 = vld.sshfl [vmem:[#allocation1 + $0x20] sm:$0xff pattern:$0x73625140]  ;;  %v339_v29 = vrot.slane %v338_v24, 4  ;;  %632 = vmatpush.msra.mxu2 %v568_v21  ;;  %v534_v23 = vsel %vm419_vm5, %v1153_v37, %v523_v18  ;;  %v529_v18 = vpop.permute.xlu2 %528 }
 0x15c   :  { %415 = vst [vmem:[#allocation1 + $0x20] ss:$4 sm:$0xff] %v380_v26  ;;  %833 = vmatpush.msrb.mxu0 %v790_v7  ;;  %v783_v37 = vld [vmem:[#allocation10 + $0xb8] sm:$0xff]  ;;  %v546_v52 = vrot.slane %v534_v23, 5  ;;  %v547_v55 = vrot.slane %v534_v23, 6  ;;  %v548_v57 = vrot.slane %v534_v23, 7 }
 0x15d   :  { %416 = vst [vmem:[#allocation1 + $0x21] ss:$4 sm:$0xff] %v381_v27  ;;  %v340_v31 = vmax.f32 %v338_v24, %v339_v29  ;;  %v567_v24 = vld [vmem:[#allocation8 + $0x18] sm:$0xff]  ;;  %v566_v29 = vld [vmem:[#allocation8 + $0x10] sm:$0xff] }
 0x15e   :  { %834 = vmatpush.msrb.mxu0 %v789_v9  ;;  %633 = vmatpush.msra.mxu2 %v567_v24 }
 0x15f   :  { %v341_v32 = vrot.slane %v340_v31, 2 }
 0x160   :  { %835 = vmatpush.msrb.mxu0 %v788_v15  ;;  %634 = vmatpush.msra.mxu2 %v566_v29 }
 0x161   :  { %v342_v35 = vmax.f32 %v340_v31, %v341_v32  ;;  %v545_v31 = vrot.slane %v534_v23, 4 }
 0x162   :  { %v409_v39 = vld.sshfl [vmem:[#allocation1] sm:$0xff pattern:$0x73625140]  ;;  %836 = vmatpush.msrb.mxu0 %v787_v19  ;;  %635 = vmatpush.msra.mxu2 %v565_v34 }
 0x163   :  { %411 = vst [vmem:[#allocation1] ss:$4 sm:$0xff] %v377_v33  ;;  %896 = vmatmul.msk.f32.vlgmr.msra.gmra.mxu1 %vm419_vm5, %v409_v39  ;;  %v343_v41 = vrot.slane %v342_v35, 1  ;;  %v781_v39 = vld [vmem:[#allocation10 + $0xa8] sm:$0xff] }
 0x164   :  { %412 = vst [vmem:[#allocation1 + $0x1] ss:$4 sm:$0xff] %v378_v38  ;;  %v418_v51 = vld.sshfl [vmem:[#allocation1 + $0x20] sm:$0xff pattern:$0x73625140]  ;;  %837 = vmatpush.msrb.mxu0 %v786_v22  ;;  %v782_v38 = vld [vmem:[#allocation10 + $0xb0] sm:$0xff]  ;;  %v537_v22 = vsel %vm419_vm5, %v1165_v50, %v529_v18 }
 0x165   :  { %413 = vst [vmem:[#allocation1 + $0x2] ss:$4 sm:$0xff] %v379_v40  ;;  %v344_v44 = vmax.f32 %v342_v35, %v343_v41  ;;  %v564_v35 = vld [vmem:[#allocation8] sm:$0xff] }
 0x166   :  { %414 = vst [vmem:[#allocation1 + $0x3] ss:$4 sm:$0xff] %v1165_v50  ;;  %838 = vmatpush.msrb.mxu0 %v785_v25  ;;  %636 = vmatpush.msra.mxu2 %v564_v35  ;;  %v780_v41 = vld [vmem:[#allocation10 + $0xa0] sm:$0xff]  ;;  %v560_v25 = vrot.slane %v537_v22, 1 }
 0x167   :  { %v736_v45 = vsel %vm735_vm6, %v344_v44, %v336_v43  ;;  %v543_v44 = vrot.slane %v534_v23, 2 }
 0x168   :  { %v754_v47 = vadd.f32 %v748_v42, %v736_v45  ;;  %839 = vmatpush.msrb.mxu0 %v784_v30  ;;  %v542_v42 = vrot.slane %v534_v23, 1 }
 0x16a   :  { %v757_v48 = vmax.f32 %v754_v47, 0.0  ;;  %840 = vmatpush.msrb.mxu0 %v783_v37  ;;  %v779_v47 = vld [vmem:[#allocation10 + $0x98] sm:$0xff] }
 0x16b   :  { %897 = vmatmul.msk.f32.gmra.mxu1 %vm419_vm5, %v410_v28 }
 0x16c   :  { %828 = vmatmul.f32.vlgmr.msra.gmra.mxu3 %v757_v48  ;;  %841 = vmatpush.msrb.mxu0 %v782_v38  ;;  %v544_v48 = vrot.slane %v534_v23, 3 }
 0x16d   :  { %v417_v49 = vld.sshfl [vmem:[#allocation1] sm:$0xff pattern:$0x73625140] }
 0x16e   :  { %842 = vmatpush.msrb.mxu0 %v781_v39 }
 0x170   :  { %843 = vmatpush.msrb.mxu0 %v780_v41  ;;  %v805_v41 = vld [vmem:[#allocation10 + $0x168] sm:$0xff] }
 0x172   :  { %844 = vmatpush.msrb.mxu0 %v779_v47 }
 0x173   :  { %898 = vmatmul.msk.f32.gmra.mxu1 %vm419_vm5, %v417_v49 }
 0x174   :  { %845 = vmatpush.msrb.mxu0 %v778_v54 }
 0x176   :  { %846 = vmatpush.msrb.mxu0 %v777_v58  ;;  %v797_v58 = vld [vmem:[#allocation10 + $0x128] sm:$0xff] }
 0x17b   :  { %899 = vmatmul.msk.f32.gmra.mxu1 %vm419_vm5, %v418_v51 }
 0x1e0   :  { %v445_v59 = vpop.f32.mrf.mxu1 }
 0x1e1   :  { %v461_v60 = vrot.slane %v445_v59, 2  ;;  %v462_v61 = vrot.slane %v445_v59, 4  ;;  %v463_v62 = vrot.slane %v445_v59, 6  ;;  %471 = vst [vmem:[#allocation1] ss:$4 sm:$0xff] %v445_v59 }
 0x1e3   :  { %473 = vst [vmem:[#allocation1 + $0x1] ss:$4 sm:$0xff] %v461_v60  ;;  %v776_v60 = vld [vmem:[#allocation10 + $0x80] sm:$0xff] }
 0x1e4   :  { %475 = vst [vmem:[#allocation1 + $0x2] ss:$4 sm:$0xff] %v462_v61  ;;  %847 = vmatpush.msrb.mxu0 %v776_v60 }
 0x1e5   :  { %477 = vst [vmem:[#allocation1 + $0x3] ss:$4 sm:$0xff] %v463_v62  ;;  %v525_v62 = vpop.permute.xlu0 %524 }
 0x1e8   :  { %v448_v63 = vpop.f32.mrf.mxu1 }
 0x1e9   :  { %v464_v0 = vrot.slane %v448_v63, 2  ;;  %v465_v1 = vrot.slane %v448_v63, 4  ;;  %v466_v2 = vrot.slane %v448_v63, 6  ;;  %479 = vst [vmem:[#allocation1 + $0x20] ss:$4 sm:$0xff] %v448_v63 }
 0x1eb   :  { %483 = vst [vmem:[#allocation1 + $0x22] ss:$4 sm:$0xff] %v465_v1 }
 0x1ec   :  { %v484_v5 = vld.sshfl [vmem:[#allocation1] sm:$0xff pattern:$0x73625140]  ;;  %481 = vst [vmem:[#allocation1 + $0x21] ss:$4 sm:$0xff] %v464_v0 }
 0x1ed   :  { %486 = vst [vmem:[#allocation1] ss:$4 sm:$0xff] %v466_v2  ;;  %v535_v2 = vsel %vm419_vm5, %v1158_v46, %v525_v62  ;;  %v795_v62 = vld [vmem:[#allocation10 + $0x118] sm:$0xff] }
 0x1ee   :  { %v549_v6 = vrot.slane %v535_v2, 1  ;;  %v552_v14 = vrot.slane %v535_v2, 4 }
 0x1f0   :  { %v451_v10 = vpop.f32.mrf.mxu1 }
 0x1f1   :  { %v467_v11 = vrot.slane %v451_v10, 2  ;;  %v468_v12 = vrot.slane %v451_v10, 4  ;;  %v469_v13 = vrot.slane %v451_v10, 6  ;;  %487 = vst [vmem:[#allocation1 + $0x1] ss:$4 sm:$0xff] %v451_v10  ;;  %v550_v10 = vrot.slane %v535_v2, 2 }
 0x1f3   :  { %v485_v16 = vld.sshfl [vmem:[#allocation1 + $0x20] sm:$0xff pattern:$0x73625140]  ;;  %488 = vst [vmem:[#allocation1 + $0x2] ss:$4 sm:$0xff] %v467_v11  ;;  %v536_v11 = vsel %vm419_vm5, %v1168_v53, %v527_v4 }
 0x1f4   :  { %489 = vst [vmem:[#allocation1 + $0x3] ss:$4 sm:$0xff] %v468_v12  ;;  %v499_v20 = vsel %vm345_vm1, %v485_v16, -inf  ;;  %v551_v12 = vrot.slane %v535_v2, 3  ;;  %v553_v15 = vrot.slane %v536_v11, 1  ;;  %v554_v17 = vrot.slane %v536_v11, 2 }
 0x1f5   :  { %490 = vst [vmem:[#allocation1 + $0x20] ss:$4 sm:$0xff] %v469_v13  ;;  %v500_v26 = vmax.f32 %v484_v5, %v499_v20  ;;  %v749_v5 = vperm.slane %v1193_v36, 1  ;;  %v555_v19 = vrot.slane %v536_v11, 3  ;;  %v556_v20 = vrot.slane %v536_v11, 4 }
 0x1f6   :  { %v557_v21 = vrot.slane %v536_v11, 5  ;;  %v559_v24 = vrot.slane %v536_v11, 7 }
 0x1f7   :  { %v501_v33 = vrot.slane %v500_v26, 4 }
 0x1f8   :  { %v454_v27 = vpop.f32.mrf.mxu1 }
 0x1f9   :  { %v470_v28 = vrot.slane %v454_v27, 2  ;;  %491 = vst [vmem:[#allocation1 + $0x21] ss:$4 sm:$0xff] %v454_v27  ;;  %v502_v40 = vmax.f32 %v500_v26, %v501_v33  ;;  %v561_v26 = vrot.slane %v537_v22, 2  ;;  %v562_v27 = vrot.slane %v537_v22, 3 }
 0x1fb   :  { %v493_v32 = vld.sshfl [vmem:[#allocation1] sm:$0xff pattern:$0x73625140]  ;;  %492 = vst [vmem:[#allocation1 + $0x22] ss:$4 sm:$0xff] %v470_v28  ;;  %v503_v49 = vrot.slane %v502_v40, 2 }
 0x1fc   :  { %588 = vst [vmem:[#allocation1 + $0x4] ss:$9 sm:$0xff] %v545_v31  ;;  %v563_v28 = vrot.slane %v537_v22, 4  ;;  %v807_v31 = vld [vmem:[#allocation10 + $0x178] sm:$0xff] }
 0x1fd   :  { %v504_v61 = vmax.f32 %v502_v40, %v503_v49  ;;  %852 = vmatpush.msrb.mxu1 %v807_v31  ;;  %v806_v40 = vld [vmem:[#allocation10 + $0x170] sm:$0xff] }
 0x1ff   :  { %v505_v0 = vrot.slane %v504_v61, 1  ;;  %853 = vmatpush.msrb.mxu1 %v806_v40 }
 0x201   :  { %v506_v8 = vmax.f32 %v504_v61, %v505_v0  ;;  %854 = vmatpush.msrb.mxu1 %v805_v41 }
 0x202   :  { %v494_v43 = vld.sshfl [vmem:[#allocation1 + $0x20] sm:$0xff pattern:$0x73625140] }
 0x203   :  { %580 = vst [vmem:[#allocation1] ss:$9 sm:$0xff] %v534_v23  ;;  %v507_v45 = vsel %vm345_vm1, %v494_v43, -inf  ;;  %v558_v23 = vrot.slane %v536_v11, 6  ;;  %v803_v43 = vld [vmem:[#allocation10 + $0x158] sm:$0xff] }
 0x204   :  { %582 = vst [vmem:[#allocation1 + $0x1] ss:$9 sm:$0xff] %v542_v42  ;;  %v508_v51 = vmax.f32 %v493_v32, %v507_v45  ;;  %v804_v42 = vld [vmem:[#allocation10 + $0x160] sm:$0xff] }
 0x205   :  { %584 = vst [vmem:[#allocation1 + $0x2] ss:$9 sm:$0xff] %v543_v44  ;;  %855 = vmatpush.msrb.mxu1 %v804_v42  ;;  %v802_v44 = vld [vmem:[#allocation10 + $0x150] sm:$0xff] }
 0x206   :  { %586 = vst [vmem:[#allocation1 + $0x3] ss:$9 sm:$0xff] %v544_v48  ;;  %v509_v56 = vrot.slane %v508_v51, 4 }
 0x207   :  { %590 = vst [vmem:[#allocation1 + $0x5] ss:$9 sm:$0xff] %v546_v52  ;;  %856 = vmatpush.msrb.mxu1 %v803_v43 }
 0x208   :  { %592 = vst [vmem:[#allocation1 + $0x6] ss:$9 sm:$0xff] %v547_v55  ;;  %v510_v59 = vmax.f32 %v508_v51, %v509_v56  ;;  %v801_v51 = vld [vmem:[#allocation10 + $0x148] sm:$0xff]  ;;  %v800_v55 = vld [vmem:[#allocation10 + $0x140] sm:$0xff]  ;;  %v799_v56 = vld [vmem:[#allocation10 + $0x138] sm:$0xff] }
 0x209   :  { %594 = vst [vmem:[#allocation1 + $0x7] ss:$9 sm:$0xff] %v548_v57  ;;  %857 = vmatpush.msrb.mxu1 %v802_v44  ;;  %v798_v57 = vld [vmem:[#allocation10 + $0x130] sm:$0xff] }
 0x20a   :  { %v511_v63 = vrot.slane %v510_v59, 2 }
 0x20b   :  { %858 = vmatpush.msrb.mxu1 %v801_v51 }
 0x20c   :  { %v512_v1 = vmax.f32 %v510_v59, %v511_v63  ;;  %v796_v59 = vld [vmem:[#allocation10 + $0x120] sm:$0xff] }
 0x20d   :  { %859 = vmatpush.msrb.mxu1 %v800_v55 }
 0x20e   :  { %v513_v3 = vrot.slane %v512_v1, 1 }
 0x20f   :  { %860 = vmatpush.msrb.mxu1 %v799_v56 }
 0x210   :  { %v595_v7 = vld [vmem:[#allocation1] sm:$0xff]  ;;  %v514_v9 = vmax.f32 %v512_v1, %v513_v3 }
 0x211   :  { %596 = vst [vmem:[#allocation1] ss:$9 sm:$0xff] %v535_v2  ;;  %637 = vmatmul.f32.vlgmr.msra.gmra.mxu2 %v595_v7  ;;  %861 = vmatpush.msrb.mxu1 %v798_v57  ;;  %v794_v2 = vld [vmem:[#allocation10 + $0x110] sm:$0xff]  ;;  %v793_v7 = vld [vmem:[#allocation10 + $0x108] sm:$0xff] }
 0x212   :  { %597 = vst [vmem:[#allocation1 + $0x1] ss:$9 sm:$0xff] %v549_v6  ;;  %v740_v13 = vsel %vm735_vm6, %v514_v9, %v506_v8  ;;  %v792_v8 = vld [vmem:[#allocation10 + $0x100] sm:$0xff] }
 0x213   :  { %598 = vst [vmem:[#allocation1 + $0x2] ss:$9 sm:$0xff] %v550_v10  ;;  %v755_v46 = vadd.f32 %v749_v5, %v740_v13  ;;  %862 = vmatpush.msrb.mxu1 %v797_v58 }
 0x214   :  { %599 = vst [vmem:[#allocation1 + $0x3] ss:$9 sm:$0xff] %v551_v12 }
 0x215   :  { %600 = vst [vmem:[#allocation1 + $0x4] ss:$9 sm:$0xff] %v552_v14  ;;  %v758_v16 = vmax.f32 %v755_v46, 0.0  ;;  %863 = vmatpush.msrb.mxu1 %v796_v59 }
 0x216   :  { %601 = vst [vmem:[#allocation1 + $0x5] ss:$9 sm:$0xff] %v536_v11 }
 0x217   :  { %602 = vst [vmem:[#allocation1 + $0x6] ss:$9 sm:$0xff] %v553_v15  ;;  %848 = vmatmul.f32.vlgmr.msrb.gmra.mxu0 %v758_v16  ;;  %864 = vmatpush.msrb.mxu1 %v795_v62 }
 0x218   :  { %603 = vst [vmem:[#allocation1 + $0x7] ss:$9 sm:$0xff] %v554_v17 }
 0x219   :  { %865 = vmatpush.msrb.mxu1 %v794_v2 }
 0x21b   :  { %866 = vmatpush.msrb.mxu1 %v793_v7 }
 0x21d   :  { %867 = vmatpush.msrb.mxu1 %v792_v8 }
 0x21f   :  { %v604_v53 = vld [vmem:[#allocation1] sm:$0xff] }
 0x220   :  { %605 = vst [vmem:[#allocation1] ss:$9 sm:$0xff] %v555_v19  ;;  %640 = vmatmul.f32.gmra.mxu2 %v604_v53 }
 0x221   :  { %606 = vst [vmem:[#allocation1 + $0x1] ss:$9 sm:$0xff] %v556_v20 }
 0x222   :  { %607 = vst [vmem:[#allocation1 + $0x2] ss:$9 sm:$0xff] %v557_v21 }
 0x223   :  { %608 = vst [vmem:[#allocation1 + $0x3] ss:$9 sm:$0xff] %v558_v23 }
 0x224   :  { %609 = vst [vmem:[#allocation1 + $0x4] ss:$9 sm:$0xff] %v559_v24 }
 0x225   :  { %610 = vst [vmem:[#allocation1 + $0x5] ss:$9 sm:$0xff] %v537_v22 }
 0x226   :  { %611 = vst [vmem:[#allocation1 + $0x6] ss:$9 sm:$0xff] %v560_v25 }
 0x227   :  { %612 = vst [vmem:[#allocation1 + $0x7] ss:$9 sm:$0xff] %v561_v26 }
 0x22e   :  { %v613_v29 = vld [vmem:[#allocation1] sm:$0xff] }
 0x22f   :  { %643 = vmatmul.f32.gmra.mxu2 %v613_v29  ;;  %614 = vst [vmem:[#allocation1] ss:$9 sm:$0xff] %v562_v27 }
 0x230   :  { %615 = vst [vmem:[#allocation1 + $0x1] ss:$9 sm:$0xff] %v563_v28  ;;  %v750_v28 = vperm.slane %v1193_v36, 2 }
 0x237   :  { %v616_v30 = vld [vmem:[#allocation1] sm:$0xff] }
 0x238   :  { %646 = vmatmul.f32.gmra.mxu2 %v616_v30 }
 0x294   :  { %v638_v50 = vpop.f32.mrf.mxu2 }
 0x295   :  { %v654_v32 = vrot.slane %v638_v50, 1  ;;  %v655_v33 = vrot.slane %v638_v50, 2  ;;  %v656_v34 = vrot.slane %v638_v50, 3  ;;  %676 = vst [vmem:[#allocation1] ss:$9 sm:$0xff] %v638_v50  ;;  %v657_v37 = vrot.slane %v638_v50, 4 }
 0x296   :  { %v658_v35 = vrot.slane %v638_v50, 5  ;;  %v659_v38 = vrot.slane %v638_v50, 6  ;;  %v660_v39 = vrot.slane %v638_v50, 7 }
 0x297   :  { %678 = vst [vmem:[#allocation1 + $0x1] ss:$9 sm:$0xff] %v654_v32 }
 0x298   :  { %680 = vst [vmem:[#allocation1 + $0x2] ss:$9 sm:$0xff] %v655_v33  ;;  %v911_v33 = vld [vmem:[%s1232_s6] ss:$0 sm:$0xff] }
 0x299   :  { %682 = vst [vmem:[#allocation1 + $0x3] ss:$9 sm:$0xff] %v656_v34  ;;  %v829_v34 = vpop.f32.mrf.mxu3 }
 0x29a   :  { %684 = vst [vmem:[#allocation1 + $0x4] ss:$9 sm:$0xff] %v657_v37  ;;  %v849_v37 = vpop.f32.mrf.mxu0 }
 0x29b   :  { %686 = vst [vmem:[#allocation1 + $0x5] ss:$9 sm:$0xff] %v658_v35  ;;  %v830_v35 = vadd.f32 %v911_v33, %v829_v34 }
 0x29c   :  { %688 = vst [vmem:[#allocation1 + $0x6] ss:$9 sm:$0xff] %v659_v38 }
 0x29d   :  { %690 = vst [vmem:[#allocation1 + $0x7] ss:$9 sm:$0xff] %v660_v39  ;;  %v850_v36 = vadd.f32 %v849_v37, %v830_v35 }
 0x2a3   :  { %v641_v45 = vpop.f32.mrf.mxu2 }
 0x2a4   :  { %v661_v47 = vrot.slane %v641_v45, 1  ;;  %v662_v48 = vrot.slane %v641_v45, 2  ;;  %v663_v49 = vrot.slane %v641_v45, 3  ;;  %v691_v52 = vld [vmem:[#allocation1] sm:$0xff]  ;;  %v664_v54 = vrot.slane %v641_v45, 4 }
 0x2a5   :  { %692 = vst [vmem:[#allocation1] ss:$9 sm:$0xff] %v641_v45  ;;  %v665_v60 = vrot.slane %v641_v45, 5  ;;  %v666_v61 = vrot.slane %v641_v45, 6  ;;  %v667_v0 = vrot.slane %v641_v45, 7 }
 0x2a6   :  { %693 = vst [vmem:[#allocation1 + $0x1] ss:$9 sm:$0xff] %v661_v47 }
 0x2a7   :  { %694 = vst [vmem:[#allocation1 + $0x2] ss:$9 sm:$0xff] %v662_v48 }
 0x2a8   :  { %695 = vst [vmem:[#allocation1 + $0x3] ss:$9 sm:$0xff] %v663_v49 }
 0x2a9   :  { %696 = vst [vmem:[#allocation1 + $0x4] ss:$9 sm:$0xff] %v664_v54 }
 0x2b0   :  { %v697_v63 = vld [vmem:[#allocation1] sm:$0xff] }
 0x2b1   :  { %698 = vst [vmem:[#allocation1] ss:$9 sm:$0xff] %v665_v60  ;;  %v717_v11 = vsel %vm515_vm2, %v697_v63, -inf }
 0x2b2   :  { %v644_v1 = vpop.f32.mrf.mxu2  ;;  %699 = vst [vmem:[#allocation1 + $0x1] ss:$9 sm:$0xff] %v666_v61  ;;  %v718_v15 = vmax.f32 %v691_v52, %v717_v11 }
 0x2b3   :  { %v668_v3 = vrot.slane %v644_v1, 1  ;;  %v669_v4 = vrot.slane %v644_v1, 2  ;;  %v670_v5 = vrot.slane %v644_v1, 3  ;;  %700 = vst [vmem:[#allocation1 + $0x2] ss:$9 sm:$0xff] %v667_v0  ;;  %v671_v6 = vrot.slane %v644_v1, 4 }
 0x2b4   :  { %701 = vst [vmem:[#allocation1 + $0x3] ss:$9 sm:$0xff] %v644_v1  ;;  %v672_v10 = vrot.slane %v644_v1, 5  ;;  %v673_v12 = vrot.slane %v644_v1, 6  ;;  %v674_v14 = vrot.slane %v644_v1, 7  ;;  %v719_v16 = vrot.slane %v718_v15, 4 }
 0x2b5   :  { %702 = vst [vmem:[#allocation1 + $0x4] ss:$9 sm:$0xff] %v668_v3 }
 0x2b6   :  { %703 = vst [vmem:[#allocation1 + $0x5] ss:$9 sm:$0xff] %v669_v4  ;;  %v720_v17 = vmax.f32 %v718_v15, %v719_v16 }
 0x2b7   :  { %704 = vst [vmem:[#allocation1 + $0x6] ss:$9 sm:$0xff] %v670_v5 }
 0x2b8   :  { %705 = vst [vmem:[#allocation1 + $0x7] ss:$9 sm:$0xff] %v671_v6  ;;  %v721_v20 = vrot.slane %v720_v17, 2 }
 0x2ba   :  { %v722_v22 = vmax.f32 %v720_v17, %v721_v20 }
 0x2bb   :  { %v647_v9 = vpop.f32.mrf.mxu2 }
 0x2bc   :  { %v675_v46 = vrot.slane %v647_v9, 1  ;;  %v723_v25 = vrot.slane %v722_v22, 1 }
 0x2be   :  { %v724_v29 = vmax.f32 %v722_v22, %v723_v25 }
 0x2bf   :  { %v706_v13 = vld [vmem:[#allocation1] sm:$0xff] }
 0x2c0   :  { %707 = vst [vmem:[#allocation1] ss:$9 sm:$0xff] %v672_v10 }
 0x2c1   :  { %708 = vst [vmem:[#allocation1 + $0x1] ss:$9 sm:$0xff] %v673_v12 }
 0x2c2   :  { %709 = vst [vmem:[#allocation1 + $0x2] ss:$9 sm:$0xff] %v674_v14 }
 0x2c3   :  { %710 = vst [vmem:[#allocation1 + $0x3] ss:$9 sm:$0xff] %v647_v9 }
 0x2c4   :  { %711 = vst [vmem:[#allocation1 + $0x4] ss:$9 sm:$0xff] %v675_v46 }
 0x2cb   :  { %v712_v18 = vld [vmem:[#allocation1] sm:$0xff] }
 0x2cc   :  { %v725_v19 = vsel %vm515_vm2, %v712_v18, -inf }
 0x2cd   :  { %v726_v53 = vmax.f32 %v706_v13, %v725_v19 }
 0x2cf   :  { %v727_v21 = vrot.slane %v726_v53, 4 }
 0x2d1   :  { %v728_v23 = vmax.f32 %v726_v53, %v727_v21 }
 0x2d3   :  { %v729_v24 = vrot.slane %v728_v23, 2 }
 0x2d5   :  { %v730_v26 = vmax.f32 %v728_v23, %v729_v24 }
 0x2d7   :  { %v731_v27 = vrot.slane %v730_v26, 1 }
 0x2d9   :  { %v732_v30 = vmax.f32 %v730_v26, %v731_v27 }
 0x2db   :  { %v744_v50 = vsel %vm735_vm6, %v732_v30, %v724_v29 }
 0x2dc   :  { %v756_v31 = vadd.f32 %v750_v28, %v744_v50 }
 0x2de   :  { %v759_v32 = vmax.f32 %v756_v31, 0.0 }
 0x2e0   :  { %868 = vmatmul.f32.vlgmr.msrb.gmra.mxu1 %v759_v32 }
 0x35d   :  { %v869_v38 = vpop.f32.mrf.mxu1 }
 0x35e   :  { %v870_v39 = vadd.f32 %v869_v38, %v850_v36 }
 0x360   :  { %872 = vst [vmem:[#allocation11] sm:$0x3] %v870_v39 }
 0x361   :  { %883 = dma.vmem_to_hbm [thread:$0]  %s879_s30, 32, %s881_s10, [#allocation4]  }
 0x362   :  { %1062 = dma.done.wait [#allocation4], 32  }
 0x363   :  { %1063 = vsyncadd [#allocation4], 4294967264 }
 0x364   :  { %888 = vsyncpa [#allocation3], 1 }
 0x365   :  { %889 = vsyncpa [#allocation6], 1 }
 0x366   :  { %890 = vsyncpa [#allocation9], 1 }
 0x367   :  { %891 = vsyncpa [#allocation4], 1 }

</bundles_post_ra>
